<compile_context>
chip_gen: v5e
topology: v5e:2x2
jax: 0.10.0
libtpu: 0.0.40
codegen_flags: <defaults>
</compile_context>

<pallas_src>
import jax
import jax.numpy as jnp
from jax.experimental import pallas as pl
from jax.experimental.pallas import tpu as pltpu

LANE = 128   # TPU lane width
HIDDEN = 32  # fixed by the module (fc1 out / fc2 in)


def _round_up(x: int, m: int) -> int:
    return (x + m - 1) // m * m


def mlp_kernel(x_ref, w1_ref, b1_ref, w2_ref, b2_ref, o_ref):
    # fc1: bf16 MXU operands, f32 accumulation (hidden padded to 128 lanes).
    x = x_ref[...].astype(jnp.bfloat16)                       # (TB, F)
    h = jnp.dot(x, w1_ref[...],                               # (F, Hp) bf16
                preferred_element_type=jnp.float32)           # (TB, Hp) f32
    # bias + ReLU in f32 on the VPU.
    h = jnp.maximum(h + b1_ref[...], 0.0)
    # fc2: bf16 MXU operands, f32 accumulation; output kept at the true
    # target width T so HBM writeback is T*4 bytes/row (not 128*4).
    y = jnp.dot(h.astype(jnp.bfloat16), w2_ref[...],          # (Hp, T) bf16
                preferred_element_type=jnp.float32)           # (TB, T) f32
    o_ref[...] = (y + b2_ref[...]).astype(o_ref.dtype)


def prepare_params(w1, b1, w2, b2):
    """One-time parameter prep: pad hidden dim to 128 lanes, cast to bf16.

    Hoisted out of the per-call path.  Zero padding is numerically exact:
    padded hidden columns get bias 0, relu(0) = 0, and feed zero rows of w2p.
    """
    F, H = w1.shape
    H2, T = w2.shape
    assert H == H2
    Hp = _round_up(max(H, LANE), LANE)                              # 32 -> 128
    w1p = jnp.pad(w1, ((0, 0), (0, Hp - H))).astype(jnp.bfloat16)   # (F, Hp)
    b1p = jnp.pad(b1.reshape(1, H).astype(jnp.float32),
                  ((0, 0), (0, Hp - H)))                            # (1, Hp)
    w2p = jnp.pad(w2, ((0, Hp - H), (0, 0))).astype(jnp.bfloat16)   # (Hp, T)
    b2p = b2.reshape(1, T).astype(jnp.float32)                      # (1, T)
    return w1p, b1p, w2p, b2p


def _choose_batch_tile(B: int, F: int, T: int, block_b: int) -> int:
    """Pick the batch tile: large (amortize ~0.35us/step), VMEM-safe on v7x,
    and split so a 'parallel' batch grid has >= 2 steps for the 2-TC v7x."""
    tb = min(block_b, _round_up(B, 8))
    # VMEM guard: x and out blocks are double-buffered and lane-padded to 128
    # in VMEM; keep them well under the ~32 MiB scoped default (v7x: 64 MiB
    # physical).  Weights are tiny and resident.
    f_pad = _round_up(max(F, LANE), LANE)
    t_pad = _round_up(max(T, LANE), LANE)
    vmem_budget = 12 * 1024 * 1024
    max_tb = max(8, (vmem_budget // (2 * 4 * (f_pad + t_pad))) // 8 * 8)
    tb = min(tb, max_tb)
    # v7x has 2 TensorCores: avoid a 1-step grid for non-tiny batches.
    if B > 8 and pl.cdiv(B, tb) < 2:
        tb = max(8, _round_up(pl.cdiv(B, 2), 8))
    return tb


def mlp_forward(x, w1p, b1p, w2p, b2p, *, block_b: int = 4096):
    """Fused two-layer MLP forward pass on pre-padded/pre-cast parameters.

    x   : [B, F]   float32
    w1p : [F, Hp]  bfloat16  (Hp = 128)
    b1p : [1, Hp]  float32
    w2p : [Hp, T]  bfloat16
    b2p : [1, T]   float32
    returns [B, T] float32
    """
    B, F = x.shape
    Fw, Hp = w1p.shape
    Hp2, T = w2p.shape
    assert F == Fw and Hp == Hp2

    TB = _choose_batch_tile(B, F, T, block_b)
    grid = (pl.cdiv(B, TB),)   # partial last block handled by Pallas

    return pl.pallas_call(
        mlp_kernel,
        out_shape=jax.ShapeDtypeStruct((B, T), jnp.float32),
        grid_spec=pl.GridSpec(
            grid=grid,
            in_specs=[
                pl.BlockSpec((TB, F), lambda i: (i, 0)),    # x: walks batch
                pl.BlockSpec((F, Hp), lambda i: (0, 0)),    # w1: resident
                pl.BlockSpec((1, Hp), lambda i: (0, 0)),    # b1: resident
                pl.BlockSpec((Hp, T), lambda i: (0, 0)),    # w2: resident
                pl.BlockSpec((1, T), lambda i: (0, 0)),     # b2: resident
            ],
            out_specs=pl.BlockSpec((TB, T), lambda i: (i, 0)),
        ),
        compiler_params=pltpu.CompilerParams(
            dimension_semantics=("parallel",)),
    )(x, w1p, b1p, w2p, b2p)


def neural_net_forward(x, w1, b1, w2, b2, *, block_b: int = 4096):
    """Convenience wrapper: prep params (pad/cast) then run the kernel."""
    return mlp_forward(x, *prepare_params(w1, b1, w2, b2), block_b=block_b)


def _reference_bf16(x, w1, b1, w2, b2):
    # Same math the kernel performs (bf16 MXU operands, f32 accumulation).
    h = jnp.dot(x.astype(jnp.bfloat16), w1.astype(jnp.bfloat16),
                preferred_element_type=jnp.float32) + b1.reshape(1, -1)
    h = jnp.maximum(h, 0.0)
    y = jnp.dot(h.astype(jnp.bfloat16), w2.astype(jnp.bfloat16),
                preferred_element_type=jnp.float32) + b2.reshape(1, -1)
    return y


if __name__ == "__main__":
    # Small shapes consistent with the module: batch=8, num_features=16,
    # hidden=32 (fixed by the module), num_targets=4.
    B, F, H, T = 8, 16, HIDDEN, 4

    key = jax.random.PRNGKey(0)
    kx, kw1, kb1, kw2, kb2 = jax.random.split(key, 5)

    x = jax.random.normal(kx, (B, F), dtype=jnp.float32)

    # Deterministic synthetic parameters (torch-Linear-like uniform init).
    w1 = jax.random.uniform(kw1, (F, H), jnp.float32, -1.0, 1.0) / jnp.sqrt(F)
    b1 = jax.random.uniform(kb1, (H,), jnp.float32, -1.0, 1.0) / jnp.sqrt(F)
    w2 = jax.random.uniform(kw2, (H, T), jnp.float32, -1.0, 1.0) / jnp.sqrt(H)
    b2 = jax.random.uniform(kb2, (T,), jnp.float32, -1.0, 1.0) / jnp.sqrt(H)

    # One-time parameter prep (hoisted out of the per-call path).
    params = prepare_params(w1, b1, w2, b2)
    fwd = jax.jit(mlp_forward)

    # 1) Module-sized problem (single tile).
    out = fwd(x, *params)
    jax.block_until_ready(out)
    ref = _reference_bf16(x, w1, b1, w2, b2)
    assert out.shape == (B, T)
    assert jnp.allclose(out, ref, atol=1e-3, rtol=1e-3)
    # bf16 operands keep the result close to the pure-f32 module output.
    ref_f32 = jnp.maximum(x @ w1 + b1, 0.0) @ w2 + b2
    assert jnp.allclose(out, ref_f32, atol=5e-2, rtol=5e-2)

    # 2) Multi-tile path (2 grid steps, even split, no batch padding).
    B2 = 640
    x2 = jax.random.normal(jax.random.PRNGKey(1), (B2, F), dtype=jnp.float32)
    out2 = fwd(x2, *params)
    jax.block_until_ready(out2)
    ref2 = _reference_bf16(x2, w1, b1, w2, b2)
    assert out2.shape == (B2, T)
    assert jnp.allclose(out2, ref2, atol=1e-3, rtol=1e-3)

    # 3) Partial-last-block path (B not a multiple of the tile).
    B3 = 600
    x3 = jax.random.normal(jax.random.PRNGKey(2), (B3, F), dtype=jnp.float32)
    out3 = fwd(x3, *params)
    jax.block_until_ready(out3)
    ref3 = _reference_bf16(x3, w1, b1, w2, b2)
    assert out3.shape == (B3, T)
    assert jnp.allclose(out3, ref3, atol=1e-3, rtol=1e-3)

    print("KERNEL_OK")
</pallas_src>

<mosaic_0001>
module attributes {stable_mosaic.version = 11 : i64} {
  func.func @mlp_kernel(%arg0: i32, %arg1: memref<8x16xf32, #tpu.memory_space<vmem>>, %arg2: memref<16x128xbf16, #tpu.memory_space<vmem>>, %arg3: memref<1x128xf32, #tpu.memory_space<vmem>>, %arg4: memref<128x4xbf16, #tpu.memory_space<vmem>>, %arg5: memref<1x4xf32, #tpu.memory_space<vmem>>, %arg6: memref<8x4xf32, #tpu.memory_space<vmem>>) attributes {dimension_semantics = [#tpu.dimension_semantics<parallel>], iteration_bounds = array<i64: 1>, scalar_prefetch = 0 : i64, scratch_operands = 0 : i64, tpu.core_type = #tpu.core_type<tc>, window_params = [{transform_indices = @transform_0, window_bounds = array<i64: 8, 16>}, {pipeline_mode = #tpu.pipeline_mode<synchronous>, transform_indices = @transform_1, window_bounds = array<i64: 16, 128>}, {pipeline_mode = #tpu.pipeline_mode<synchronous>, transform_indices = @transform_2, window_bounds = array<i64: 1, 128>}, {pipeline_mode = #tpu.pipeline_mode<synchronous>, transform_indices = @transform_3, window_bounds = array<i64: 128, 4>}, {pipeline_mode = #tpu.pipeline_mode<synchronous>, transform_indices = @transform_4, window_bounds = array<i64: 1, 4>}, {transform_indices = @transform_5, window_bounds = array<i64: 8, 4>}]} {
    %c0 = arith.constant 0 : index
    %c0_0 = arith.constant 0 : index
    %0 = vector.load %arg1[%c0, %c0_0] : memref<8x16xf32, #tpu.memory_space<vmem>>, vector<8x16xf32>
    %1 = arith.truncf %0 : vector<8x16xf32> to vector<8x16xbf16>
    %c0_1 = arith.constant 0 : index
    %c0_2 = arith.constant 0 : index
    %2 = vector.load %arg2[%c0_1, %c0_2] : memref<16x128xbf16, #tpu.memory_space<vmem>>, vector<16x128xbf16>
    %cst = arith.constant dense<0.000000e+00> : vector<8x128xf32>
    %3 = tpu.matmul %1, %2, %cst {dimension_numbers = #tpu.dot_dimension_numbers<[1], [0], [0], [1], [0, 0, 1, 1], [], []>} : vector<8x16xbf16>, vector<16x128xbf16>, vector<8x128xf32> -> vector<8x128xf32>
    %c0_3 = arith.constant 0 : index
    %c0_4 = arith.constant 0 : index
    %4 = vector.load %arg3[%c0_3, %c0_4] : memref<1x128xf32, #tpu.memory_space<vmem>>, vector<1x128xf32>
    %5 = vector.broadcast %4 : vector<1x128xf32> to vector<8x128xf32>
    %6 = arith.addf %3, %5 : vector<8x128xf32>
    %cst_5 = arith.constant 0.000000e+00 : f32
    %7 = vector.broadcast %cst_5 : f32 to vector<8x128xf32>
    %8 = arith.maximumf %6, %7 : vector<8x128xf32>
    %9 = arith.truncf %8 : vector<8x128xf32> to vector<8x128xbf16>
    %c0_6 = arith.constant 0 : index
    %c0_7 = arith.constant 0 : index
    %10 = vector.load %arg4[%c0_6, %c0_7] : memref<128x4xbf16, #tpu.memory_space<vmem>>, vector<128x4xbf16>
    %cst_8 = arith.constant dense<0.000000e+00> : vector<8x4xf32>
    %11 = tpu.matmul %9, %10, %cst_8 {dimension_numbers = #tpu.dot_dimension_numbers<[1], [0], [0], [1], [0, 0, 1, 1], [], []>} : vector<8x128xbf16>, vector<128x4xbf16>, vector<8x4xf32> -> vector<8x4xf32>
    %c0_9 = arith.constant 0 : index
    %c0_10 = arith.constant 0 : index
    %12 = vector.load %arg5[%c0_9, %c0_10] : memref<1x4xf32, #tpu.memory_space<vmem>>, vector<1x4xf32>
    %13 = vector.broadcast %12 : vector<1x4xf32> to vector<8x4xf32>
    %14 = arith.addf %11, %13 : vector<8x4xf32>
    %c0_11 = arith.constant 0 : index
    %c0_12 = arith.constant 0 : index
    %15 = vector.load %arg6[%c0_11, %c0_12] : memref<8x4xf32, #tpu.memory_space<vmem>>, vector<8x4xf32>
    tpu.vector_store %arg6[%c0_11, %c0_12], %14 {strides = array<i32>} : memref<8x4xf32, #tpu.memory_space<vmem>>, vector<8x4xf32>,
    return
  }
  func.func @transform_0(%arg0: i32) -> (i32, i32) {
    %c0_i32 = arith.constant 0 : i32
    %c0_i32_0 = arith.constant 0 : i32
    return %arg0, %c0_i32 : i32, i32
  }
  func.func @transform_1(%arg0: i32) -> (i32, i32) {
    %c0_i32 = arith.constant 0 : i32
    %c0_i32_0 = arith.constant 0 : i32
    %c0_i32_1 = arith.constant 0 : i32
    return %c0_i32, %c0_i32_0 : i32, i32
  }
  func.func @transform_2(%arg0: i32) -> (i32, i32) {
    %c0_i32 = arith.constant 0 : i32
    %c0_i32_0 = arith.constant 0 : i32
    %c0_i32_1 = arith.constant 0 : i32
    return %c0_i32, %c0_i32_0 : i32, i32
  }
  func.func @transform_3(%arg0: i32) -> (i32, i32) {
    %c0_i32 = arith.constant 0 : i32
    %c0_i32_0 = arith.constant 0 : i32
    %c0_i32_1 = arith.constant 0 : i32
    return %c0_i32, %c0_i32_0 : i32, i32
  }
  func.func @transform_4(%arg0: i32) -> (i32, i32) {
    %c0_i32 = arith.constant 0 : i32
    %c0_i32_0 = arith.constant 0 : i32
    %c0_i32_1 = arith.constant 0 : i32
    return %c0_i32, %c0_i32_0 : i32, i32
  }
  func.func @transform_5(%arg0: i32) -> (i32, i32) {
    %c0_i32 = arith.constant 0 : i32
    %c0_i32_0 = arith.constant 0 : i32
    return %arg0, %c0_i32 : i32, i32
  }
}

</mosaic_0001>

<bundles_post_ra>
// kernel: mlp_forward.1
= control target key start
LH: loop header
LB: loop body
LE: loop exit
PB: predicated region body
PF: predicated region fallthrough
CT: control target
= control target key end

     0   :  { %vm35_vm0 = vcmask 130048   ;;  %vm135_vm1 = vcmask 31744   ;;  %s258_s1 = inlined_call_operand.vmem [shape: bf16[16,128], index: 1, kind: input, shape index: {}]   ;;  %s259_s0 = inlined_call_operand.vmem [shape: f32[8,16], index: 0, kind: input, shape index: {}]   ;;  %s260_s3 = inlined_call_operand.vmem [shape: bf16[128,4], index: 3, kind: input, shape index: {}]   ;;  %s261_s2 = inlined_call_operand.vmem [shape: f32[1,128], index: 2, kind: input, shape index: {}]   ;;  %s262_s4 = inlined_call_operand.vmem [shape: f32[1,4], index: 4, kind: input, shape index: {}]   ;;  %s263_s5 = inlined_call_operand.vmem [shape: f32[8,4], index: 5, kind: output, shape index: {}]  }
   0x1   :  { %v178_v0 = vld [vmem:[%s258_s1] sm:$0xff]  ;;  %v186_v2 = vld [vmem:[%s260_s3 + $0x38] sm:$0xff]  ;;  %v185_v4 = vld [vmem:[%s260_s3 + $0x30] sm:$0xff] }
   0x2   :  { %v21_v1 = vld [vmem:[%s259_s0] sm:$0xff]  ;;  %46 = vmatpush.bf16.msra.mxu0 %v178_v0  ;;  %122 = vmatpush.bf16.msra.mxu1 %v186_v2  ;;  %v184_v5 = vld [vmem:[%s260_s3 + $0x28] sm:$0xff]  ;;  %v182_v7 = vld [vmem:[%s260_s3 + $0x18] sm:$0xff] }
   0x3   :  { %v22_v3 = vpack.c.bf16 %v21_v1, %v21_v1  ;;  %v183_v6 = vld [vmem:[%s260_s3 + $0x20] sm:$0xff]  ;;  %v181_v8 = vld [vmem:[%s260_s3 + $0x10] sm:$0xff]  ;;  %v180_v9 = vld [vmem:[%s260_s3 + $0x8] sm:$0xff] }
   0x4   :  { %v179_v10 = vld [vmem:[%s260_s3] sm:$0xff] }
   0x5   :  { %145 = vmatmul.msk.bf16.vlgmr.msra.gmra.mxu0 %vm35_vm0, %v22_v3  ;;  %v187_v11 = vld [vmem:[%s261_s2] ss:$0 sm:$0xff] }
   0x6   :  { %123 = vmatpush.bf16.msra.mxu1 %v185_v4  ;;  %v188_v17 = vld [vmem:[%s262_s4] ss:$0 sm:$0xff] }
   0xa   :  { %124 = vmatpush.bf16.msra.mxu1 %v184_v5 }
   0xe   :  { %125 = vmatpush.bf16.msra.mxu1 %v183_v6 }
  0x12   :  { %126 = vmatpush.bf16.msra.mxu1 %v182_v7 }
  0x16   :  { %127 = vmatpush.bf16.msra.mxu1 %v181_v8 }
  0x1a   :  { %128 = vmatpush.bf16.msra.mxu1 %v180_v9 }
  0x1e   :  { %129 = vmatpush.bf16.msra.mxu1 %v179_v10 }
  0x82   :  { %v48_v12 = vpop.f32.mrf.mxu0 }
  0x83   :  { %v49_v13 = vadd.f32 %v187_v11, %v48_v12 }
  0x85   :  { %v52_v14 = vmax.f32 %v49_v13, 0.0 }
  0x87   :  { %v53_v15 = vpack.c.bf16 %v52_v14, %v52_v14 }
  0x89   :  { %130 = vmatmul.bf16.vlgmr.msra.gmra.mxu1 %v53_v15 }
  0x8a   :  { %v50_v16 = vpop.f32.mrf.mxu0 }
 0x106   :  { %v131_v18 = vpop.f32.mrf.mxu1 }
 0x107   :  { %v132_v19 = vadd.f32 %v188_v17, %v131_v18 }
 0x109   :  { %136 = vst.msk [vmem:[%s263_s5] sm:$0xff] %vm135_vm1, %v132_v19 }
 0x10e   :  { %v133_v20 = vpop.f32.mrf.mxu1 }

</bundles_post_ra>
